<compile_context>
chip_gen: v6e
topology: v6e:2x2x1
jax: 0.10.0
libtpu: 0.0.40
codegen_flags: <defaults>
</compile_context>

<pallas_src>
import functools

import jax
import jax.numpy as jnp
from jax.experimental import pallas as pl
from jax.experimental.pallas import tpu as pltpu

# ---------------- configuration (small synthetic sizes) ----------------
FEATURE_DIM = 32
MAX_VIEWS = 8
AGG_HEADS = 2
BATCH = 2
LN_EPS = 1e-5
NEG = -1e30


def _layer_norm(x, g, b, eps=LN_EPS):
    mu = jnp.mean(x, axis=-1, keepdims=True)
    var = jnp.mean((x - mu) * (x - mu), axis=-1, keepdims=True)
    return (x - mu) * jax.lax.rsqrt(var + eps) * g + b


def _encoder_tile_kernel(
    feat_ref,   # (TB*V, D) f32   feature tokens of this batch tile (batch-major)
    mask_ref,   # (1, N, N) f32   combined additive mask (block-diag + key padding)
    wqkv_ref,   # (D+1, P)  bf16  fused QKV weight^T (scale folded into q cols) + bias row
    w1b_ref,    # (D+1, 4D) bf16  linear1.weight^T + bias row
    w2o_ref,    # (5D, D)   bf16  rows [0:D)=out_proj.weight^T, rows [D:5D)=linear2.weight^T
    vec_ref,    # (9+V, D)  f32   packed small vectors + positional tail
    out_ref,    # (TB, D)   f32   aggregated CLS features
    xbuf,       # VMEM scratch (N, D) f32
    *, H, V, D, hd, TB,
):
    N = TB * (V + 1)
    f32 = jnp.float32
    bf16 = jnp.bfloat16

    # ---- unpack the packed small-vector slab ----
    cls_row = vec_ref[0:1, :]            # cls_token + pos[0]
    bo      = vec_ref[1:2, :]
    ln1g    = vec_ref[2:3, :]
    ln1b    = vec_ref[3:4, :]
    b2      = vec_ref[4:5, :]
    ln2g    = vec_ref[5:6, :]
    ln2b    = vec_ref[6:7, :]
    lnfg    = vec_ref[7:8, :]
    lnfb    = vec_ref[8:9, :]
    pos_t   = vec_ref[9:9 + V, :]        # (V, D) positional tail pos[1:]

    # ---- assemble the token matrix: [TB cls rows | TB*V feature rows] ----
    xbuf[0:TB, :] = jnp.broadcast_to(cls_row, (TB, D))
    xbuf[TB:N, :] = feat_ref[...] + jnp.tile(pos_t, (TB, 1))   # pos repeats every V rows
    x = xbuf[...]                                              # (N, D) f32

    add_mask = mask_ref[0]                                     # (N, N) f32, grid-step DMA

    # ---- fused QKV projection: one lane-dense bf16 matmul, f32 accumulation ----
    qkv = (jnp.dot(x.astype(bf16), wqkv_ref[0:D, :], preferred_element_type=f32)
           + wqkv_ref[D:D + 1, :].astype(f32))                 # (N, P); q pre-scaled

    # ---- multi-head self-attention (static unroll over H == 2) ----
    heads_out = []
    for h in range(H):
        qh = qkv[:, h * hd:(h + 1) * hd].astype(bf16)
        kh = qkv[:, D + h * hd:D + (h + 1) * hd].astype(bf16)
        vh = qkv[:, 2 * D + h * hd:2 * D + (h + 1) * hd].astype(bf16)
        s = jax.lax.dot_general(qh, kh, (((1,), (1,)), ((), ())),
                                preferred_element_type=f32) + add_mask
        s = s - jnp.max(s, axis=-1, keepdims=True)
        p = jnp.exp(s)
        p = p * pl.reciprocal(jnp.sum(p, axis=-1, keepdims=True), approx=True)
        heads_out.append(jnp.dot(p.astype(bf16), vh, preferred_element_type=f32))
    oh = jnp.concatenate(heads_out, axis=-1)                   # (N, D)

    attn = jnp.dot(oh.astype(bf16), w2o_ref[0:D, :], preferred_element_type=f32) + bo

    # ---- residual + norm1, FFN(relu) + residual + norm2 (post-LN, f32 path) ----
    x = _layer_norm(x + attn, ln1g, ln1b)
    h1 = (jnp.dot(x.astype(bf16), w1b_ref[0:D, :], preferred_element_type=f32)
          + w1b_ref[D:D + 1, :].astype(f32))
    h1 = jnp.maximum(h1, 0.0)
    x = _layer_norm(
        x + jnp.dot(h1.astype(bf16), w2o_ref[D:5 * D, :], preferred_element_type=f32) + b2,
        ln2g, ln2b)

    # ---- CLS rows (first TB rows) + final LayerNorm ----
    out_ref[...] = _layer_norm(x[0:TB, :], lnfg, lnfb)


def transformer_view_aggregator(features, view_mask, params, *,
                                num_heads=AGG_HEADS, batch_tile=32):
    """features: [B, max_views, D] f32, view_mask: [B, max_views] bool -> [B, D] f32."""
    B, V, D = features.shape
    H = num_heads
    assert D % H == 0
    hd = D // H
    S = V + 1
    f32 = jnp.float32
    bf16 = jnp.bfloat16

    # ---- tile selection: sublane-aligned when tiling; >= 2 tiles for megacore (v7x) ----
    TB = min(batch_tile, B)
    if B > TB:
        TB = ((TB + 7) // 8) * 8
    if B >= 16 and pl.cdiv(B, TB) == 1:
        TB = ((pl.cdiv(B, 2) + 7) // 8) * 8
    G = pl.cdiv(B, TB)
    Bp = G * TB
    N = TB * S

    if Bp != B:                                      # pad batch to whole tiles
        features = jnp.concatenate(
            [features, jnp.zeros((Bp - B, V, D), features.dtype)], axis=0)
        view_mask = jnp.concatenate(
            [view_mask, jnp.zeros((Bp - B, V), dtype=bool)], axis=0)

    feats2d = features.astype(f32).reshape(Bp * V, D)          # batch-major token rows

    # ---- combined additive attention mask per grid tile (host precompute) ----
    bid = jnp.concatenate([jnp.arange(TB, dtype=jnp.int32),
                           jnp.repeat(jnp.arange(TB, dtype=jnp.int32), V)])   # (N,)
    block_diag = jnp.where(bid[:, None] == bid[None, :], 0.0, NEG).astype(f32)  # (N, N)
    col_valid = jnp.concatenate(
        [jnp.ones((G, TB), bool), view_mask.reshape(G, TB * V)], axis=1)        # (G, N)
    mask = (block_diag[None, :, :]
            + jnp.where(col_valid, 0.0, NEG).astype(f32)[:, None, :])           # (G, N, N)

    # ---- fused QKV weight: softmax scale folded into q columns, padded to 128 lanes ----
    scale = 1.0 / float(hd) ** 0.5
    wq = params["in_proj_w"].astype(f32).T                      # (D, 3D): [q | k | v] cols
    bq = params["in_proj_b"].astype(f32).reshape(1, 3 * D)
    col_scale = jnp.concatenate(
        [jnp.full((D,), scale, f32), jnp.ones((2 * D,), f32)])
    wq = wq * col_scale
    bq = bq * col_scale
    P = ((3 * D + 127) // 128) * 128
    pad = P - 3 * D
    wqkv = jnp.concatenate([
        jnp.concatenate([wq, jnp.zeros((D, pad), f32)], axis=1),
        jnp.concatenate([bq, jnp.zeros((1, pad), f32)], axis=1),
    ], axis=0).astype(bf16)                                     # (D+1, P)

    w1b = jnp.concatenate(
        [params["lin1_w"].astype(f32).T,
         params["lin1_b"].astype(f32).reshape(1, 4 * D)], axis=0).astype(bf16)  # (D+1, 4D)

    w2o = jnp.concatenate(
        [params["out_proj_w"].astype(f32).T,                     # (D, D)
         params["lin2_w"].astype(f32).T], axis=0).astype(bf16)   # (4D, D) -> (5D, D)

    pos = params["pos_emb"].astype(f32).reshape(-1, D)[:S]                      # (S, D)
    vecs = jnp.concatenate([
        params["cls_token"].reshape(1, D).astype(f32) + pos[0:1, :],            # cls + pos0
        params["out_proj_b"].reshape(1, D).astype(f32),
        params["ln1_g"].reshape(1, D).astype(f32), params["ln1_b"].reshape(1, D).astype(f32),
        params["lin2_b"].reshape(1, D).astype(f32),
        params["ln2_g"].reshape(1, D).astype(f32), params["ln2_b"].reshape(1, D).astype(f32),
        params["lnf_g"].reshape(1, D).astype(f32), params["lnf_b"].reshape(1, D).astype(f32),
        pos[1:, :],                                                              # (V, D)
    ], axis=0)                                                                   # (9+V, D)

    kernel = functools.partial(_encoder_tile_kernel, H=H, V=V, D=D, hd=hd, TB=TB)

    # rough per-step VMEM footprint: (N,N) score/prob temporaries + double-buffered mask
    vmem_est = 4 * (6 * N * N + 3 * N * P + 6 * N * D + 2 * TB * V * D)
    vmem_limit = int(min(48 * 2 ** 20, max(32 * 2 ** 20, 2 * vmem_est)))

    out = pl.pallas_call(
        kernel,
        out_shape=jax.ShapeDtypeStruct((Bp, D), f32),
        grid_spec=pltpu.PrefetchScalarGridSpec(
            num_scalar_prefetch=0,
            grid=(G,),
            in_specs=[
                pl.BlockSpec((TB * V, D), lambda g: (g, 0)),     # feature tokens
                pl.BlockSpec((1, N, N), lambda g: (g, 0, 0)),    # additive mask
                pl.BlockSpec(wqkv.shape, lambda g: (0, 0)),      # fused QKV w+b (bf16)
                pl.BlockSpec(w1b.shape, lambda g: (0, 0)),       # FFN lin1 w+b (bf16)
                pl.BlockSpec(w2o.shape, lambda g: (0, 0)),       # out_proj^T / lin2^T (bf16)
                pl.BlockSpec(vecs.shape, lambda g: (0, 0)),      # packed small params (f32)
            ],
            out_specs=pl.BlockSpec((TB, D), lambda g: (g, 0)),
            scratch_shapes=[pltpu.VMEM((N, D), f32)],
        ),
        compiler_params=pltpu.CompilerParams(
            dimension_semantics=("parallel",),
            vmem_limit_bytes=vmem_limit),
    )(feats2d, mask, wqkv, w1b, w2o, vecs)

    return out[:B]


# ---------------- pure-JAX reference (mirrors the PyTorch module, eval mode) ----------------
def _reference(features, view_mask, params):
    B, V, D = features.shape
    S = V + 1
    H = AGG_HEADS
    hd = D // H

    cls = jnp.broadcast_to(params["cls_token"], (B, 1, D))
    x = jnp.concatenate([cls, features], axis=1) + params["pos_emb"][:, :S, :]
    valid = jnp.concatenate([jnp.ones((B, 1), bool), view_mask], axis=1)     # (B, S)
    bias = jnp.where(valid, 0.0, -jnp.inf)[:, None, None, :]                 # (B,1,1,S)

    ipw, ipb = params["in_proj_w"], params["in_proj_b"]
    q = x @ ipw[:D].T + ipb[:D]
    k = x @ ipw[D:2 * D].T + ipb[D:2 * D]
    v = x @ ipw[2 * D:].T + ipb[2 * D:]

    def heads(t):
        return t.reshape(B, S, H, hd).transpose(0, 2, 1, 3)                  # (B,H,S,hd)

    s = jnp.einsum("bhqe,bhke->bhqk", heads(q), heads(k)) / jnp.sqrt(float(hd)) + bias
    p = jax.nn.softmax(s, axis=-1)
    o = jnp.einsum("bhqk,bhke->bhqe", p, heads(v)).transpose(0, 2, 1, 3).reshape(B, S, D)
    attn = o @ params["out_proj_w"].T + params["out_proj_b"]

    def ln(t, g, b):
        mu = t.mean(-1, keepdims=True)
        var = ((t - mu) ** 2).mean(-1, keepdims=True)
        return (t - mu) * jax.lax.rsqrt(var + LN_EPS) * g + b

    x = ln(x + attn, params["ln1_g"], params["ln1_b"])
    h1 = jax.nn.relu(x @ params["lin1_w"].T + params["lin1_b"])
    x = ln(x + h1 @ params["lin2_w"].T + params["lin2_b"],
           params["ln2_g"], params["ln2_b"])
    return ln(x[:, 0, :], params["lnf_g"], params["lnf_b"])


def init_params(key, feature_dim, max_views):
    D = feature_dim
    ks = jax.random.split(key, 8)
    return {
        "cls_token": 0.02 * jax.random.normal(ks[0], (1, 1, D), jnp.float32),
        "pos_emb": 0.02 * jax.random.normal(ks[1], (1, max_views + 1, D), jnp.float32),
        "in_proj_w": 0.05 * jax.random.normal(ks[2], (3 * D, D), jnp.float32),
        "in_proj_b": 0.05 * jax.random.normal(ks[3], (3 * D,), jnp.float32),
        "out_proj_w": 0.05 * jax.random.normal(ks[4], (D, D), jnp.float32),
        "out_proj_b": jnp.zeros((D,), jnp.float32),
        "lin1_w": 0.05 * jax.random.normal(ks[5], (4 * D, D), jnp.float32),
        "lin1_b": jnp.zeros((4 * D,), jnp.float32),
        "lin2_w": 0.05 * jax.random.normal(ks[6], (D, 4 * D), jnp.float32),
        "lin2_b": jnp.zeros((D,), jnp.float32),
        "ln1_g": jnp.ones((D,), jnp.float32), "ln1_b": jnp.zeros((D,), jnp.float32),
        "ln2_g": jnp.ones((D,), jnp.float32), "ln2_b": jnp.zeros((D,), jnp.float32),
        "lnf_g": jnp.ones((D,), jnp.float32), "lnf_b": jnp.zeros((D,), jnp.float32),
    }


if __name__ == "__main__":
    key = jax.random.PRNGKey(0)
    kp, kf = jax.random.split(key)
    params = init_params(kp, FEATURE_DIM, MAX_VIEWS)

    features = jax.random.normal(kf, (BATCH, MAX_VIEWS, FEATURE_DIM), jnp.float32)
    # first batch element: all views valid; second: only first 3 views valid
    view_mask = jnp.array(
        [[True] * MAX_VIEWS,
         [True, True, True] + [False] * (MAX_VIEWS - 3)], dtype=bool)

    out = transformer_view_aggregator(features, view_mask, params)
    jax.block_until_ready(out)
    assert out.shape == (BATCH, FEATURE_DIM)
    assert bool(jnp.all(jnp.isfinite(out)))

    ref = _reference(features, view_mask, params)
    err = float(jnp.max(jnp.abs(out - ref)))
    assert err < 1e-1, f"kernel/reference mismatch: max abs err = {err}"
    print("KERNEL_OK")
</pallas_src>

<mosaic_0001>
module attributes {stable_mosaic.version = 11 : i64} {
  func.func @_encoder_tile_kernel(%arg0: i32, %arg1: memref<16x32xf32, #tpu.memory_space<vmem>>, %arg2: memref<1x18x18xf32, #tpu.memory_space<vmem>>, %arg3: memref<33x128xbf16, #tpu.memory_space<vmem>>, %arg4: memref<33x128xbf16, #tpu.memory_space<vmem>>, %arg5: memref<160x32xbf16, #tpu.memory_space<vmem>>, %arg6: memref<17x32xf32, #tpu.memory_space<vmem>>, %arg7: memref<2x32xf32, #tpu.memory_space<vmem>>, %arg8: memref<18x32xf32, #tpu.memory_space<vmem>>) attributes {dimension_semantics = [#tpu.dimension_semantics<parallel>], iteration_bounds = array<i64: 1>, scalar_prefetch = 0 : i64, scratch_operands = 1 : i64, tpu.core_type = #tpu.core_type<tc>, window_params = [{transform_indices = @transform_0, window_bounds = array<i64: 16, 32>}, {transform_indices = @transform_1, window_bounds = array<i64: 1, 18, 18>}, {pipeline_mode = #tpu.pipeline_mode<synchronous>, transform_indices = @transform_2, window_bounds = array<i64: 33, 128>}, {pipeline_mode = #tpu.pipeline_mode<synchronous>, transform_indices = @transform_3, window_bounds = array<i64: 33, 128>}, {pipeline_mode = #tpu.pipeline_mode<synchronous>, transform_indices = @transform_4, window_bounds = array<i64: 160, 32>}, {pipeline_mode = #tpu.pipeline_mode<synchronous>, transform_indices = @transform_5, window_bounds = array<i64: 17, 32>}, {transform_indices = @transform_6, window_bounds = array<i64: 2, 32>}]} {
    %c0 = arith.constant 0 : index
    %c0_0 = arith.constant 0 : index
    %0 = vector.load %arg6[%c0, %c0_0] : memref<17x32xf32, #tpu.memory_space<vmem>>, vector<1x32xf32>
    %c1 = arith.constant 1 : index
    %c0_1 = arith.constant 0 : index
    %1 = vector.load %arg6[%c1, %c0_1] : memref<17x32xf32, #tpu.memory_space<vmem>>, vector<1x32xf32>
    %c2 = arith.constant 2 : index
    %c0_2 = arith.constant 0 : index
    %2 = vector.load %arg6[%c2, %c0_2] : memref<17x32xf32, #tpu.memory_space<vmem>>, vector<1x32xf32>
    %c3 = arith.constant 3 : index
    %c0_3 = arith.constant 0 : index
    %3 = vector.load %arg6[%c3, %c0_3] : memref<17x32xf32, #tpu.memory_space<vmem>>, vector<1x32xf32>
    %c4 = arith.constant 4 : index
    %c0_4 = arith.constant 0 : index
    %4 = vector.load %arg6[%c4, %c0_4] : memref<17x32xf32, #tpu.memory_space<vmem>>, vector<1x32xf32>
    %c5 = arith.constant 5 : index
    %c0_5 = arith.constant 0 : index
    %5 = vector.load %arg6[%c5, %c0_5] : memref<17x32xf32, #tpu.memory_space<vmem>>, vector<1x32xf32>
    %c6 = arith.constant 6 : index
    %c0_6 = arith.constant 0 : index
    %6 = vector.load %arg6[%c6, %c0_6] : memref<17x32xf32, #tpu.memory_space<vmem>>, vector<1x32xf32>
    %c7 = arith.constant 7 : index
    %c0_7 = arith.constant 0 : index
    %7 = vector.load %arg6[%c7, %c0_7] : memref<17x32xf32, #tpu.memory_space<vmem>>, vector<1x32xf32>
    %c8 = arith.constant 8 : index
    %c0_8 = arith.constant 0 : index
    %8 = vector.load %arg6[%c8, %c0_8] : memref<17x32xf32, #tpu.memory_space<vmem>>, vector<1x32xf32>
    %c9 = arith.constant 9 : index
    %c0_9 = arith.constant 0 : index
    %9 = vector.load %arg6[%c9, %c0_9] : memref<17x32xf32, #tpu.memory_space<vmem>>, vector<8x32xf32>
    %10 = vector.shape_cast %0 : vector<1x32xf32> to vector<1x32xf32>
    %11 = vector.broadcast %10 : vector<1x32xf32> to vector<2x32xf32>
    %c0_10 = arith.constant 0 : index
    %c0_11 = arith.constant 0 : index
    %12 = vector.load %arg8[%c0_10, %c0_11] : memref<18x32xf32, #tpu.memory_space<vmem>>, vector<2x32xf32>
    tpu.vector_store %arg8[%c0_10, %c0_11], %11 {strides = array<i32>} : memref<18x32xf32, #tpu.memory_space<vmem>>, vector<2x32xf32>,
    %c0_12 = arith.constant 0 : index
    %c0_13 = arith.constant 0 : index
    %13 = vector.load %arg1[%c0_12, %c0_13] : memref<16x32xf32, #tpu.memory_space<vmem>>, vector<16x32xf32>
    %14 = tpu.concatenate %9, %9 in 0 : vector<8x32xf32>, vector<8x32xf32> -> vector<16x32xf32>
    %15 = arith.addf %13, %14 : vector<16x32xf32>
    %c2_14 = arith.constant 2 : index
    %c0_15 = arith.constant 0 : index
    %16 = vector.load %arg8[%c2_14, %c0_15] : memref<18x32xf32, #tpu.memory_space<vmem>>, vector<16x32xf32>
    tpu.vector_store %arg8[%c2_14, %c0_15], %15 {strides = array<i32>} : memref<18x32xf32, #tpu.memory_space<vmem>>, vector<16x32xf32>,
    %c0_16 = arith.constant 0 : index
    %c0_17 = arith.constant 0 : index
    %17 = vector.load %arg8[%c0_16, %c0_17] : memref<18x32xf32, #tpu.memory_space<vmem>>, vector<18x32xf32>
    %c0_18 = arith.constant 0 : index
    %c0_19 = arith.constant 0 : index
    %c0_20 = arith.constant 0 : index
    %18 = vector.load %arg2[%c0_18, %c0_19, %c0_20] : memref<1x18x18xf32, #tpu.memory_space<vmem>>, vector<1x18x18xf32>
    %19 = vector.shape_cast %18 : vector<1x18x18xf32> to vector<18x18xf32>
    %20 = arith.truncf %17 : vector<18x32xf32> to vector<18x32xbf16>
    %c0_21 = arith.constant 0 : index
    %c0_22 = arith.constant 0 : index
    %21 = vector.load %arg3[%c0_21, %c0_22] : memref<33x128xbf16, #tpu.memory_space<vmem>>, vector<32x128xbf16>
    %cst = arith.constant dense<0.000000e+00> : vector<18x128xf32>
    %22 = tpu.matmul %20, %21, %cst {dimension_numbers = #tpu.dot_dimension_numbers<[1], [0], [0], [1], [0, 0, 1, 1], [], []>} : vector<18x32xbf16>, vector<32x128xbf16>, vector<18x128xf32> -> vector<18x128xf32>
    %c32 = arith.constant 32 : index
    %c0_23 = arith.constant 0 : index
    %23 = vector.load %arg3[%c32, %c0_23] : memref<33x128xbf16, #tpu.memory_space<vmem>>, vector<1x128xbf16>
    %24 = arith.extf %23 : vector<1x128xbf16> to vector<1x128xf32>
    %25 = vector.broadcast %24 : vector<1x128xf32> to vector<18x128xf32>
    %26 = arith.addf %22, %25 : vector<18x128xf32>
    %27 = vector.extract_strided_slice %26 {offsets = [0, 0], sizes = [18, 16], strides = [1, 1]} : vector<18x128xf32> to vector<18x16xf32>
    %28 = arith.truncf %27 : vector<18x16xf32> to vector<18x16xbf16>
    %29 = vector.extract_strided_slice %26 {offsets = [0, 32], sizes = [18, 16], strides = [1, 1]} : vector<18x128xf32> to vector<18x16xf32>
    %30 = arith.truncf %29 : vector<18x16xf32> to vector<18x16xbf16>
    %31 = vector.extract_strided_slice %26 {offsets = [0, 64], sizes = [18, 16], strides = [1, 1]} : vector<18x128xf32> to vector<18x16xf32>
    %32 = arith.truncf %31 : vector<18x16xf32> to vector<18x16xbf16>
    %cst_24 = arith.constant dense<0.000000e+00> : vector<18x18xf32>
    %33 = tpu.matmul %28, %30, %cst_24 {dimension_numbers = #tpu.dot_dimension_numbers<[1], [1], [0], [0], [0, 0, 1, 0], [], []>} : vector<18x16xbf16>, vector<18x16xbf16>, vector<18x18xf32> -> vector<18x18xf32>
    %34 = arith.addf %33, %19 : vector<18x18xf32>
    %cst_25 = arith.constant dense<0xFF800000> : vector<18xf32>
    %35 = vector.multi_reduction <maximumf>, %34, %cst_25 [1] : vector<18x18xf32> to vector<18xf32>
    %36 = vector.shape_cast %35 : vector<18xf32> to vector<18x1xf32>
    %37 = vector.broadcast %36 : vector<18x1xf32> to vector<18x18xf32>
    %38 = arith.subf %34, %37 : vector<18x18xf32>
    %39 = math.exp %38 : vector<18x18xf32>
    %cst_26 = arith.constant dense<0.000000e+00> : vector<18xf32>
    %40 = vector.multi_reduction <add>, %39, %cst_26 [1] : vector<18x18xf32> to vector<18xf32>
    %41 = vector.shape_cast %40 : vector<18xf32> to vector<18x1xf32>
    %42 = tpu.reciprocal %41 {approx = true} : vector<18x1xf32> -> vector<18x1xf32>
    %43 = vector.broadcast %42 : vector<18x1xf32> to vector<18x18xf32>
    %44 = arith.mulf %39, %43 : vector<18x18xf32>
    %45 = arith.truncf %44 : vector<18x18xf32> to vector<18x18xbf16>
    %cst_27 = arith.constant dense<0.000000e+00> : vector<18x16xf32>
    %46 = tpu.matmul %45, %32, %cst_27 {dimension_numbers = #tpu.dot_dimension_numbers<[1], [0], [0], [1], [0, 0, 1, 1], [], []>} : vector<18x18xbf16>, vector<18x16xbf16>, vector<18x16xf32> -> vector<18x16xf32>
    %47 = vector.extract_strided_slice %26 {offsets = [0, 16], sizes = [18, 16], strides = [1, 1]} : vector<18x128xf32> to vector<18x16xf32>
    %48 = arith.truncf %47 : vector<18x16xf32> to vector<18x16xbf16>
    %49 = vector.extract_strided_slice %26 {offsets = [0, 48], sizes = [18, 16], strides = [1, 1]} : vector<18x128xf32> to vector<18x16xf32>
    %50 = arith.truncf %49 : vector<18x16xf32> to vector<18x16xbf16>
    %51 = vector.extract_strided_slice %26 {offsets = [0, 80], sizes = [18, 16], strides = [1, 1]} : vector<18x128xf32> to vector<18x16xf32>
    %52 = arith.truncf %51 : vector<18x16xf32> to vector<18x16xbf16>
    %cst_28 = arith.constant dense<0.000000e+00> : vector<18x18xf32>
    %53 = tpu.matmul %48, %50, %cst_28 {dimension_numbers = #tpu.dot_dimension_numbers<[1], [1], [0], [0], [0, 0, 1, 0], [], []>} : vector<18x16xbf16>, vector<18x16xbf16>, vector<18x18xf32> -> vector<18x18xf32>
    %54 = arith.addf %53, %19 : vector<18x18xf32>
    %cst_29 = arith.constant dense<0xFF800000> : vector<18xf32>
    %55 = vector.multi_reduction <maximumf>, %54, %cst_29 [1] : vector<18x18xf32> to vector<18xf32>
    %56 = vector.shape_cast %55 : vector<18xf32> to vector<18x1xf32>
    %57 = vector.broadcast %56 : vector<18x1xf32> to vector<18x18xf32>
    %58 = arith.subf %54, %57 : vector<18x18xf32>
    %59 = math.exp %58 : vector<18x18xf32>
    %cst_30 = arith.constant dense<0.000000e+00> : vector<18xf32>
    %60 = vector.multi_reduction <add>, %59, %cst_30 [1] : vector<18x18xf32> to vector<18xf32>
    %61 = vector.shape_cast %60 : vector<18xf32> to vector<18x1xf32>
    %62 = tpu.reciprocal %61 {approx = true} : vector<18x1xf32> -> vector<18x1xf32>
    %63 = vector.broadcast %62 : vector<18x1xf32> to vector<18x18xf32>
    %64 = arith.mulf %59, %63 : vector<18x18xf32>
    %65 = arith.truncf %64 : vector<18x18xf32> to vector<18x18xbf16>
    %cst_31 = arith.constant dense<0.000000e+00> : vector<18x16xf32>
    %66 = tpu.matmul %65, %52, %cst_31 {dimension_numbers = #tpu.dot_dimension_numbers<[1], [0], [0], [1], [0, 0, 1, 1], [], []>} : vector<18x18xbf16>, vector<18x16xbf16>, vector<18x16xf32> -> vector<18x16xf32>
    %67 = tpu.concatenate %46, %66 in 1 : vector<18x16xf32>, vector<18x16xf32> -> vector<18x32xf32>
    %68 = arith.truncf %67 : vector<18x32xf32> to vector<18x32xbf16>
    %c0_32 = arith.constant 0 : index
    %c0_33 = arith.constant 0 : index
    %69 = vector.load %arg5[%c0_32, %c0_33] : memref<160x32xbf16, #tpu.memory_space<vmem>>, vector<32x32xbf16>
    %cst_34 = arith.constant dense<0.000000e+00> : vector<18x32xf32>
    %70 = tpu.matmul %68, %69, %cst_34 {dimension_numbers = #tpu.dot_dimension_numbers<[1], [0], [0], [1], [0, 0, 1, 1], [], []>} : vector<18x32xbf16>, vector<32x32xbf16>, vector<18x32xf32> -> vector<18x32xf32>
    %71 = vector.broadcast %1 : vector<1x32xf32> to vector<18x32xf32>
    %72 = arith.addf %70, %71 : vector<18x32xf32>
    %73 = arith.addf %17, %72 : vector<18x32xf32>
    %cst_35 = arith.constant dense<0.000000e+00> : vector<18xf32>
    %74 = vector.multi_reduction <add>, %73, %cst_35 [1] : vector<18x32xf32> to vector<18xf32>
    %75 = vector.shape_cast %74 : vector<18xf32> to vector<18x1xf32>
    %cst_36 = arith.constant 3.200000e+01 : f32
    %76 = vector.broadcast %cst_36 : f32 to vector<18x1xf32>
    %77 = arith.divf %75, %76 : vector<18x1xf32>
    %78 = vector.broadcast %77 : vector<18x1xf32> to vector<18x32xf32>
    %79 = arith.subf %73, %78 : vector<18x32xf32>
    %80 = vector.broadcast %77 : vector<18x1xf32> to vector<18x32xf32>
    %81 = arith.subf %73, %80 : vector<18x32xf32>
    %82 = arith.mulf %79, %81 : vector<18x32xf32>
    %cst_37 = arith.constant dense<0.000000e+00> : vector<18xf32>
    %83 = vector.multi_reduction <add>, %82, %cst_37 [1] : vector<18x32xf32> to vector<18xf32>
    %84 = vector.shape_cast %83 : vector<18xf32> to vector<18x1xf32>
    %cst_38 = arith.constant 3.200000e+01 : f32
    %85 = vector.broadcast %cst_38 : f32 to vector<18x1xf32>
    %86 = arith.divf %84, %85 : vector<18x1xf32>
    %87 = vector.broadcast %77 : vector<18x1xf32> to vector<18x32xf32>
    %88 = arith.subf %73, %87 : vector<18x32xf32>
    %cst_39 = arith.constant 9.99999974E-6 : f32
    %89 = vector.broadcast %cst_39 : f32 to vector<18x1xf32>
    %90 = arith.addf %86, %89 : vector<18x1xf32>
    %91 = math.rsqrt %90 : vector<18x1xf32>
    %92 = vector.broadcast %91 : vector<18x1xf32> to vector<18x32xf32>
    %93 = arith.mulf %88, %92 : vector<18x32xf32>
    %94 = vector.broadcast %2 : vector<1x32xf32> to vector<18x32xf32>
    %95 = arith.mulf %93, %94 : vector<18x32xf32>
    %96 = vector.broadcast %3 : vector<1x32xf32> to vector<18x32xf32>
    %97 = arith.addf %95, %96 : vector<18x32xf32>
    %98 = arith.truncf %97 : vector<18x32xf32> to vector<18x32xbf16>
    %c0_40 = arith.constant 0 : index
    %c0_41 = arith.constant 0 : index
    %99 = vector.load %arg4[%c0_40, %c0_41] : memref<33x128xbf16, #tpu.memory_space<vmem>>, vector<32x128xbf16>
    %cst_42 = arith.constant dense<0.000000e+00> : vector<18x128xf32>
    %100 = tpu.matmul %98, %99, %cst_42 {dimension_numbers = #tpu.dot_dimension_numbers<[1], [0], [0], [1], [0, 0, 1, 1], [], []>} : vector<18x32xbf16>, vector<32x128xbf16>, vector<18x128xf32> -> vector<18x128xf32>
    %c32_43 = arith.constant 32 : index
    %c0_44 = arith.constant 0 : index
    %101 = vector.load %arg4[%c32_43, %c0_44] : memref<33x128xbf16, #tpu.memory_space<vmem>>, vector<1x128xbf16>
    %102 = arith.extf %101 : vector<1x128xbf16> to vector<1x128xf32>
    %103 = vector.broadcast %102 : vector<1x128xf32> to vector<18x128xf32>
    %104 = arith.addf %100, %103 : vector<18x128xf32>
    %cst_45 = arith.constant 0.000000e+00 : f32
    %105 = vector.broadcast %cst_45 : f32 to vector<18x128xf32>
    %106 = arith.maximumf %104, %105 : vector<18x128xf32>
    %107 = arith.truncf %106 : vector<18x128xf32> to vector<18x128xbf16>
    %c32_46 = arith.constant 32 : index
    %c0_47 = arith.constant 0 : index
    %108 = vector.load %arg5[%c32_46, %c0_47] : memref<160x32xbf16, #tpu.memory_space<vmem>>, vector<128x32xbf16>
    %cst_48 = arith.constant dense<0.000000e+00> : vector<18x32xf32>
    %109 = tpu.matmul %107, %108, %cst_48 {dimension_numbers = #tpu.dot_dimension_numbers<[1], [0], [0], [1], [0, 0, 1, 1], [], []>} : vector<18x128xbf16>, vector<128x32xbf16>, vector<18x32xf32> -> vector<18x32xf32>
    %110 = arith.addf %97, %109 : vector<18x32xf32>
    %111 = vector.broadcast %4 : vector<1x32xf32> to vector<18x32xf32>
    %112 = arith.addf %110, %111 : vector<18x32xf32>
    %cst_49 = arith.constant dense<0.000000e+00> : vector<18xf32>
    %113 = vector.multi_reduction <add>, %112, %cst_49 [1] : vector<18x32xf32> to vector<18xf32>
    %114 = vector.shape_cast %113 : vector<18xf32> to vector<18x1xf32>
    %cst_50 = arith.constant 3.200000e+01 : f32
    %115 = vector.broadcast %cst_50 : f32 to vector<18x1xf32>
    %116 = arith.divf %114, %115 : vector<18x1xf32>
    %117 = vector.broadcast %116 : vector<18x1xf32> to vector<18x32xf32>
    %118 = arith.subf %112, %117 : vector<18x32xf32>
    %119 = vector.broadcast %116 : vector<18x1xf32> to vector<18x32xf32>
    %120 = arith.subf %112, %119 : vector<18x32xf32>
    %121 = arith.mulf %118, %120 : vector<18x32xf32>
    %cst_51 = arith.constant dense<0.000000e+00> : vector<18xf32>
    %122 = vector.multi_reduction <add>, %121, %cst_51 [1] : vector<18x32xf32> to vector<18xf32>
    %123 = vector.shape_cast %122 : vector<18xf32> to vector<18x1xf32>
    %cst_52 = arith.constant 3.200000e+01 : f32
    %124 = vector.broadcast %cst_52 : f32 to vector<18x1xf32>
    %125 = arith.divf %123, %124 : vector<18x1xf32>
    %126 = vector.broadcast %116 : vector<18x1xf32> to vector<18x32xf32>
    %127 = arith.subf %112, %126 : vector<18x32xf32>
    %cst_53 = arith.constant 9.99999974E-6 : f32
    %128 = vector.broadcast %cst_53 : f32 to vector<18x1xf32>
    %129 = arith.addf %125, %128 : vector<18x1xf32>
    %130 = math.rsqrt %129 : vector<18x1xf32>
    %131 = vector.broadcast %130 : vector<18x1xf32> to vector<18x32xf32>
    %132 = arith.mulf %127, %131 : vector<18x32xf32>
    %133 = vector.broadcast %5 : vector<1x32xf32> to vector<18x32xf32>
    %134 = arith.mulf %132, %133 : vector<18x32xf32>
    %135 = vector.broadcast %6 : vector<1x32xf32> to vector<18x32xf32>
    %136 = arith.addf %134, %135 : vector<18x32xf32>
    %137 = vector.extract_strided_slice %136 {offsets = [0, 0], sizes = [2, 32], strides = [1, 1]} : vector<18x32xf32> to vector<2x32xf32>
    %cst_54 = arith.constant dense<0.000000e+00> : vector<2xf32>
    %138 = vector.multi_reduction <add>, %137, %cst_54 [1] : vector<2x32xf32> to vector<2xf32>
    %139 = vector.shape_cast %138 : vector<2xf32> to vector<2x1xf32>
    %cst_55 = arith.constant 3.200000e+01 : f32
    %140 = vector.broadcast %cst_55 : f32 to vector<2x1xf32>
    %141 = arith.divf %139, %140 : vector<2x1xf32>
    %142 = vector.broadcast %141 : vector<2x1xf32> to vector<2x32xf32>
    %143 = arith.subf %137, %142 : vector<2x32xf32>
    %144 = vector.broadcast %141 : vector<2x1xf32> to vector<2x32xf32>
    %145 = arith.subf %137, %144 : vector<2x32xf32>
    %146 = arith.mulf %143, %145 : vector<2x32xf32>
    %cst_56 = arith.constant dense<0.000000e+00> : vector<2xf32>
    %147 = vector.multi_reduction <add>, %146, %cst_56 [1] : vector<2x32xf32> to vector<2xf32>
    %148 = vector.shape_cast %147 : vector<2xf32> to vector<2x1xf32>
    %cst_57 = arith.constant 3.200000e+01 : f32
    %149 = vector.broadcast %cst_57 : f32 to vector<2x1xf32>
    %150 = arith.divf %148, %149 : vector<2x1xf32>
    %151 = vector.broadcast %141 : vector<2x1xf32> to vector<2x32xf32>
    %152 = arith.subf %137, %151 : vector<2x32xf32>
    %cst_58 = arith.constant 9.99999974E-6 : f32
    %153 = vector.broadcast %cst_58 : f32 to vector<2x1xf32>
    %154 = arith.addf %150, %153 : vector<2x1xf32>
    %155 = math.rsqrt %154 : vector<2x1xf32>
    %156 = vector.broadcast %155 : vector<2x1xf32> to vector<2x32xf32>
    %157 = arith.mulf %152, %156 : vector<2x32xf32>
    %158 = vector.broadcast %7 : vector<1x32xf32> to vector<2x32xf32>
    %159 = arith.mulf %157, %158 : vector<2x32xf32>
    %160 = vector.broadcast %8 : vector<1x32xf32> to vector<2x32xf32>
    %161 = arith.addf %159, %160 : vector<2x32xf32>
    %c0_59 = arith.constant 0 : index
    %c0_60 = arith.constant 0 : index
    %162 = vector.load %arg7[%c0_59, %c0_60] : memref<2x32xf32, #tpu.memory_space<vmem>>, vector<2x32xf32>
    tpu.vector_store %arg7[%c0_59, %c0_60], %161 {strides = array<i32>} : memref<2x32xf32, #tpu.memory_space<vmem>>, vector<2x32xf32>,
    return
  }
  func.func @transform_0(%arg0: i32) -> (i32, i32) {
    %c0_i32 = arith.constant 0 : i32
    %c0_i32_0 = arith.constant 0 : i32
    return %arg0, %c0_i32 : i32, i32
  }
  func.func @transform_1(%arg0: i32) -> (i32, i32, i32) {
    %c0_i32 = arith.constant 0 : i32
    %c0_i32_0 = arith.constant 0 : i32
    %c0_i32_1 = arith.constant 0 : i32
    return %arg0, %c0_i32, %c0_i32_0 : i32, i32, i32
  }
  func.func @transform_2(%arg0: i32) -> (i32, i32) {
    %c0_i32 = arith.constant 0 : i32
    %c0_i32_0 = arith.constant 0 : i32
    %c0_i32_1 = arith.constant 0 : i32
    return %c0_i32, %c0_i32_0 : i32, i32
  }
  func.func @transform_3(%arg0: i32) -> (i32, i32) {
    %c0_i32 = arith.constant 0 : i32
    %c0_i32_0 = arith.constant 0 : i32
    %c0_i32_1 = arith.constant 0 : i32
    return %c0_i32, %c0_i32_0 : i32, i32
  }
  func.func @transform_4(%arg0: i32) -> (i32, i32) {
    %c0_i32 = arith.constant 0 : i32
    %c0_i32_0 = arith.constant 0 : i32
    %c0_i32_1 = arith.constant 0 : i32
    return %c0_i32, %c0_i32_0 : i32, i32
  }
  func.func @transform_5(%arg0: i32) -> (i32, i32) {
    %c0_i32 = arith.constant 0 : i32
    %c0_i32_0 = arith.constant 0 : i32
    %c0_i32_1 = arith.constant 0 : i32
    return %c0_i32, %c0_i32_0 : i32, i32
  }
  func.func @transform_6(%arg0: i32) -> (i32, i32) {
    %c0_i32 = arith.constant 0 : i32
    %c0_i32_0 = arith.constant 0 : i32
    return %arg0, %c0_i32 : i32, i32
  }
}

</mosaic_0001>

<bundles_post_ra>
// kernel: tpu_custom_call.1
= control target key start
LH: loop header
LB: loop body
LE: loop exit
PB: predicated region body
PF: predicated region fallthrough
CT: control target
= control target key end

     0   :  { %vm39_vm0 = vcmask 254976   ;;  %vm45_vm1 = vcmask 261120   ;;  %s1365_s0 = inlined_call_operand.vmem [shape: f32[16,32], index: 0, kind: input, shape index: {}]   ;;  %s1366_s1 = inlined_call_operand.vmem [shape: f32[1,18,18], index: 1, kind: input, shape index: {}]   ;;  %s1367_s2 = inlined_call_operand.vmem [shape: bf16[33,128], index: 2, kind: input, shape index: {}]   ;;  %s1368_s3 = inlined_call_operand.vmem [shape: bf16[33,128], index: 3, kind: input, shape index: {}]   ;;  %s1369_s4 = inlined_call_operand.vmem [shape: bf16[160,32], index: 4, kind: input, shape index: {}]   ;;  %s1370_s5 = inlined_call_operand.vmem [shape: f32[17,32], index: 5, kind: input, shape index: {}]   ;;  %s1371_s6 = inlined_call_operand.hbm [shape: f32[2,32], index: 6, kind: output, shape index: {}]  }
   0x1   :  { %v1043_v0 = vld [vmem:[%s1367_s2 + $0x8] sm:$0xff]   ;;  %v1044_v1 = vld [vmem:[%s1367_s2] sm:$0xff]  }
   0x2   :  { %949 = vmatprep.subr.bf16.mxu0 %v1043_v0  ;;  %v874_v2 = vld [vmem:[%s1370_s5] ss:$0 sm:$0xff]  ;;  %v34_v3 = vld [vmem:[%s1370_s5 + $0x9] sm:$0xff] }
   0x3   :  { %v41_v4 = vld [vmem:[%s1365_s0] sm:$0xff]  ;;  %950 = vmatpush3.bf16.msra.mxu0 %v1043_v0  ;;  %40 = vst.msk [vmem:[#allocation2] sm:$0x3] %vm39_vm0, %v874_v2  ;;  %v42_v5 = vld [vmem:[%s1365_s0 + $0x8] sm:$0xff] }
   0x4   :  { %v43_v6 = vadd.f32 %v41_v4, %v34_v3  ;;  %951 = vmatprep.subr.bf16.mxu0 %v1044_v1  ;;  %v44_v7 = vadd.f32 %v42_v5, %v34_v3 }
   0x6   :  { %46 = vst.msk [vmem:[#allocation2 + $0x2] sm:$0xff] %vm45_vm1, %v43_v6  ;;  %47 = vst.msk [vmem:[#allocation2 + $0xa] sm:$0xff] %vm45_vm1, %v44_v7 }
   0x7   :  { %952 = vmatpush3.bf16.msra.mxu0 %v1044_v1 }
   0xd   :  { %v1176_v8 = vld [vmem:[#allocation2] sm:$0xff] }
   0xe   :  { %11 = vsyncpa [#allocation4], 0  ;;  %v1178_v9 = vld [vmem:[#allocation2 + $0x8] sm:$0xff]  ;;  %v1180_v10 = vld [vmem:[#allocation2 + $0x10] sm:$0x3]  ;;  %v62_v13 = vlaneseq  ;;  %s1113_s10 = smov 96  }
   0xf   :  { %v54_v11 = vpack.c.bf16 %v1178_v9, %v1176_v8  ;;  %v55_v12 = vpack.c.bf16 %v1180_v10, %v1180_v10  ;;  %v60_v15 = vld [vmem:[%s1367_s2 + $0x10] sm:$0x1]  ;;  %vm140_vm2 = vcmask 130048   ;;  %v1218_v34 = vld [vmem:[%s1366_s1] sm:$0xff]  ;;  %vm208_vm3 = vcmask 140288   ;;  %v1226_v40 = vld [vmem:[%s1366_s1 + $0x8] sm:$0xff] }
  0x10   :  { %v1188_v14 = vshrl.u32 %v62_v13, 7  ;;  %v61_v16 = vunpack.c.l.bf16 %v60_v15  ;;  %v1213_v32 = vld [vmem:[%s1366_s1 + $0x10] sm:$0x3]  ;;  %vm201_vm4 = vcmask 146432   ;;  %s1114_s16 = smov 80   ;;  %s1115_s17 = smov 64  }
  0x11   :  { %953 = vmatprep.mubr.msk.bf16.mxu0 %vm45_vm1, %v54_v11  ;;  %vm249_vm5 = vcmask 1040384   ;;  %s1116_s1 = smov 112   ;;  %s1117_s18 = smov 48  }
  0x12   :  { %954 = vmatmul.mubr.msk.bf16.vlgmr.msra.gmra.mxu0 %vm45_vm1, %v55_v12  ;;  %v64_v17 = vsub.s32 0, %v1188_v14  ;;  %s1118_s23 = smov 16   ;;  %v906_v14 = vld [vmem:[%s1370_s5 + $0x4] ss:$0 sm:$0xff]  ;;  %s1119_s0 = smov [#allocation3]  }
  0x13   :  { %s866_s9 = sshll.u32 %s1119_s0, 4  ;;  %s867_s9 = int_to_ptr.vmem [resolvable:$true] %s866_s9 }
  0x14   :  { %v65_v18 = vrot.slane %v61_v16, %v64_v17  ;;  %p1096_p1 = scmp.lt.s32.totalorder %s867_s9, %s867_s9 }
  0xd2   :  { %v955_v19 = vpop.f32.mrf.mxu0 }
  0xd3   :  { %v127_v20 = vadd.f32 %v955_v19, %v65_v18 }
  0xd4   :  { %v118_v21 = vpop.f32.mrf.mxu0 }
  0xd5   :  { %v1196_v22 = vpack.c.bf16 %v127_v20, %v127_v20  ;;  %v119_v25 = vadd.f32 %v118_v21, %v65_v18 }
  0xd6   :  { %v956_v23 = vpop.f32.mrf.mxu0 }
  0xd7   :  { %138 = vrot.lane.b32.xlu0 %v1196_v22, %s1113_s10 }
  0xd8   :  { %v121_v24 = vpop.f32.mrf.mxu0 }
  0xd9   :  { %v122_v26 = vadd.f32 %v121_v24, %v65_v18 }
  0xdb   :  { %v1199_v27 = vpack.c.bf16 %v122_v26, %v119_v25 }
  0xdd   :  { %136 = vrot.lane.b32.xlu0 %v1199_v27, %s1113_s10  ;;  %961 = vmatprep.mubr.msk.bf16.mxu0 %vm140_vm2, %v1199_v27  ;;  %s1091_s10 = scalar_lea.vmem %s867_s9, 32 }
  0xde   :  { %p1092_p0 = scmp.ne.s32.totalorder %s867_s9, %s1091_s10  ;;  %p1097_p2 = scmp.lt.s32.totalorder %s1091_s10, %s1091_s10 }
  0xe0   :  { %p1098_p3 = por %p1097_p2, %p1096_p1 }
  0xe2   :  { %p1099_p4 = pnand %p1098_p3, %p1092_p0 }
 0x149   :  { %v139_v28 = vpop.permute.xlu0 %138 }
 0x14a   :  { %v151_v29 = vsel %vm140_vm2, %v139_v28, 0  ;;  %1025 = vmatprep.subr.msk.bf16.mxu0 %vm140_vm2, %v139_v28 }
 0x14b   :  { %958 = vmatpush3.bf16.xpose.msra.mxu0 %v151_v29 }
 0x14f   :  { %v137_v30 = vpop.permute.xlu0 %136 }
 0x150   :  { %1026 = vmatprep.subr.msk.bf16.mxu0 %vm140_vm2, %v137_v30  ;;  %v148_v31 = vsel %vm140_vm2, %v137_v30, 0 }
 0x153   :  { %960 = vmatpush3.bf16.xpose.msra.mxu0 %v148_v31 }
 0x15a   :  { %962 = vmatmul.mubr.msk.bf16.vlgmr.msra.gmra.mxu0 %vm140_vm2, %v1196_v22 }
 0x21a   :  { %v963_v33 = vpop.f32.mrf.mxu0 }
 0x21b   :  { %v196_v35 = vadd.f32 %v963_v33, %v1213_v32 }
 0x21c   :  { %v187_v36 = vpop.f32.mrf.mxu0 }
 0x21d   :  { %v188_v37 = vadd.f32 %v187_v36, %v1218_v34  ;;  %v209_v38 = vsel %vm208_vm3, %v196_v35, -inf }
 0x21e   :  { %210 = vmax.xlane.f32.xlu0 %v209_v38  ;;  %v964_v39 = vpop.f32.mrf.mxu0 }
 0x21f   :  { %v202_v41 = vsel %vm201_vm4, %v188_v37, -inf }
 0x220   :  { %v190_v42 = vpop.f32.mrf.mxu0  ;;  %203 = vmax.xlane.f32.xlu1 %v202_v41 }
 0x221   :  { %v191_v43 = vadd.f32 %v190_v42, %v1226_v40 }
 0x223   :  { %v205_v44 = vsel %vm201_vm4, %v191_v43, -inf }
 0x224   :  { %206 = vmax.xlane.f32.xlu1 %v205_v44 }
 0x234   :  { %307 = vrot.lane.b32.xlu0 %v1196_v22, %s1114_s16 }
 0x235   :  { %240 = vrot.lane.b32.xlu1 %v1196_v22, %s1115_s17 }
 0x2a7   :  { %v211_v45 = vpop.xlane.xlu0 %210 }
 0x2a8   :  { %v214_v46 = vsub.f32 %v196_v35, %v211_v45 }
 0x2a9   :  { %v204_v47 = vpop.xlane.xlu1 %203 }
 0x2aa   :  { %v219_v48 = vmul.f32 1.442695, %v214_v46  ;;  %v212_v49 = vsub.f32 %v188_v37, %v204_v47 }
 0x2ab   :  { %v308_v2 = vpop.permute.xlu0 %307 }
 0x2ac   :  { %1057 = vpow2.f32 %v219_v48  ;;  %v215_v50 = vmul.f32 1.442695, %v212_v49  ;;  %v319_v16 = vsel %vm140_vm2, %v308_v2, 0 }
 0x2ad   :  { %v207_v51 = vpop.xlane.xlu1 %206 }
 0x2ae   :  { %1059 = vpow2.f32 %v215_v50  ;;  %v213_v52 = vsub.f32 %v191_v43, %v207_v51 }
 0x2b0   :  { %v217_v53 = vmul.f32 1.442695, %v213_v52 }
 0x2b1   :  { %v241_v54 = vpop.permute.xlu1 %240 }
 0x2b2   :  { %1061 = vpow2.f32 %v217_v53  ;;  %v251_v55 = vsel %vm249_vm5, %v241_v54, 0  ;;  %1027 = vmatprep.subr.msk.bf16.mxu0 %vm249_vm5, %v241_v54 }
 0x2b3   :  { %966 = vmatpush3.bf16.msra.mxu0 %v251_v55 }
 0x2b9   :  { %v1058_v56 = vpop.eup %1057 }
 0x2ba   :  { %v227_v57 = vsel %vm208_vm3, %v1058_v56, 0.0 }
 0x2bb   :  { %v1060_v58 = vpop.eup %1059  ;;  %228 = vadd.xlane.f32.xlu1 %v227_v57 }
 0x2bc   :  { %v221_v59 = vsel %vm201_vm4, %v1060_v58, 0.0 }
 0x2bf   :  { %v1062_v60 = vpop.eup %1061  ;;  %222 = vadd.xlane.f32.xlu1 %v221_v59 }
 0x2c0   :  { %v224_v61 = vsel %vm201_vm4, %v1062_v60, 0.0 }
 0x2c3   :  { %225 = vadd.xlane.f32.xlu1 %v224_v61 }
 0x2d4   :  { %238 = vrot.lane.b32.xlu1 %v1199_v27, %s1115_s17 }
 0x2d8   :  { %305 = vrot.lane.b32.xlu1 %v1199_v27, %s1114_s16 }
 0x2dc   :  { %301 = vrot.lane.b32.xlu1 %v1199_v27, %s1116_s1 }
 0x2e0   :  { %303 = vrot.lane.b32.xlu1 %v1196_v22, %s1116_s1 }
 0x344   :  { %v229_v62 = vpop.xlane.xlu1 %228 }
 0x345   :  { %1063 = vrcp.f32 %v229_v62 }
 0x348   :  { %v223_v63 = vpop.xlane.xlu1 %222 }
 0x349   :  { %1065 = vrcp.f32 %v223_v63 }
 0x34c   :  { %v226_v0 = vpop.xlane.xlu1 %225 }
 0x34d   :  { %1067 = vrcp.f32 %v226_v0  ;;  %v1045_v0 = vld [vmem:[%s1369_s4 + $0x8] sm:$0xff]  }
 0x350   :  { %v239_v1 = vpop.permute.xlu1 %238 }
 0x351   :  { %967 = vmatprep.subr.bf16.mxu0 %v239_v1 }
 0x352   :  { %968 = vmatpush3.bf16.msra.mxu0 %v239_v1  ;;  %v1064_v3 = vpop.eup %1063  ;;  %v1046_v1 = vld [vmem:[%s1369_s4] sm:$0xff]  }
 0x353   :  { %1028 = vmatprep.subr.msk.bf16.mxu0 %vm140_vm2, %v308_v2  ;;  %v235_v7 = vmul.f32 %v1064_v3, %v1058_v56 }
 0x354   :  { %v306_v6 = vpop.permute.xlu1 %305 }
 0x355   :  { %v237_v15 = vpack.c.bf16 %v235_v7, %v235_v7  ;;  %v316_v19 = vsel %vm140_vm2, %v306_v6, 0 }
 0x356   :  { %v1066_v4 = vpop.eup %1065 }
 0x357   :  { %v233_v11 = vmul.f32 %v1066_v4, %v1060_v58 }
 0x358   :  { %v302_v18 = vpop.permute.xlu1 %301 }
 0x35a   :  { %v1068_v5 = vpop.eup %1067 }
 0x35b   :  { %v234_v12 = vmul.f32 %v1068_v5, %v1062_v60 }
 0x35c   :  { %v304_v20 = vpop.permute.xlu1 %303 }
 0x35d   :  { %v236_v13 = vpack.c.bf16 %v234_v12, %v233_v11 }
 0x35f   :  { %969 = vmatprep.mubr.msk.bf16.mxu0 %vm201_vm4, %v236_v13 }
 0x360   :  { %970 = vmatmul.mubr.msk.bf16.vlgmr.msra.gmra.mxu0 %vm201_vm4, %v237_v15 }
 0x361   :  { %974 = vmatpush3.bf16.xpose.msra.mxu0 %v319_v16  ;;  %977 = vmatprep.mubr.msk.bf16.mxu0 %vm140_vm2, %v302_v18 }
 0x362   :  { %1029 = vmatprep.subr.msk.bf16.mxu0 %vm140_vm2, %v306_v6 }
 0x369   :  { %976 = vmatpush3.bf16.xpose.msra.mxu0 %v316_v19 }
 0x370   :  { %978 = vmatmul.mubr.msk.bf16.vlgmr.msra.gmra.mxu0 %vm140_vm2, %v304_v20 }
 0x420   :  { %v1252_v21 = vpop.f32.mrf.mxu0 }
 0x422   :  { %v1254_v23 = vpop.f32.mrf.mxu0 }
 0x424   :  { %v972_v24 = vpop.f32.mrf.mxu0 }
 0x426   :  { %v1256_v25 = vpop.f32.mrf.mxu0 }
 0x430   :  { %v979_v26 = vpop.f32.mrf.mxu0 }
 0x431   :  { %v364_v31 = vadd.f32 %v979_v26, %v1213_v32  ;;  %v887_v26 = vld [vmem:[%s1370_s5 + $0x1] ss:$0 sm:$0xff] }
 0x432   :  { %v355_v28 = vpop.f32.mrf.mxu0 }
 0x433   :  { %v356_v29 = vadd.f32 %v355_v28, %v1218_v34  ;;  %v375_v38 = vsel %vm208_vm3, %v364_v31, -inf }
 0x434   :  { %v980_v30 = vpop.f32.mrf.mxu0 }
 0x435   :  { %v369_v33 = vsel %vm201_vm4, %v356_v29, -inf }
 0x436   :  { %v358_v35 = vpop.f32.mrf.mxu0  ;;  %370 = vmax.xlane.f32.xlu1 %v369_v33 }
 0x437   :  { %v359_v36 = vadd.f32 %v358_v35, %v1226_v40 }
 0x439   :  { %v372_v37 = vsel %vm201_vm4, %v359_v36, -inf }
 0x43a   :  { %373 = vmax.xlane.f32.xlu0 %v372_v37  ;;  %376 = vmax.xlane.f32.xlu1 %v375_v38 }
 0x4bf   :  { %v371_v39 = vpop.xlane.xlu1 %370 }
 0x4c0   :  { %v378_v41 = vsub.f32 %v356_v29, %v371_v39 }
 0x4c2   :  { %v381_v46 = vmul.f32 1.442695, %v378_v41 }
 0x4c3   :  { %v374_v42 = vpop.xlane.xlu0 %373  ;;  %v377_v43 = vpop.xlane.xlu1 %376 }
 0x4c4   :  { %v379_v34 = vsub.f32 %v359_v36, %v374_v42  ;;  %v380_v44 = vsub.f32 %v364_v31, %v377_v43 }
 0x4c6   :  { %v383_v45 = vmul.f32 1.442695, %v379_v34  ;;  %v385_v32 = vmul.f32 1.442695, %v380_v44 }
 0x4c8   :  { %1069 = vpow2.f32 %v383_v45 }
 0x4c9   :  { %1071 = vpow2.f32 %v385_v32 }
 0x4ca   :  { %1073 = vpow2.f32 %v381_v46 }
 0x4d5   :  { %v1070_v47 = vpop.eup %1069 }
 0x4d6   :  { %v1072_v40 = vpop.eup %1071  ;;  %v390_v48 = vsel %vm201_vm4, %v1070_v47, 0.0 }
 0x4d7   :  { %391 = vadd.xlane.f32.xlu1 %v390_v48  ;;  %v393_v49 = vsel %vm208_vm3, %v1072_v40, 0.0  ;;  %v1074_v50 = vpop.eup %1073 }
 0x4d8   :  { %394 = vadd.xlane.f32.xlu0 %v393_v49  ;;  %v387_v51 = vsel %vm201_vm4, %v1074_v50, 0.0  ;;  %v1047_v49 = vld [vmem:[%s1368_s3 + $0x8] sm:$0xff]  }
 0x4d9   :  { %997 = vmatprep.subr.bf16.mxu0 %v1047_v49 }
 0x4da   :  { %998 = vmatpush3.bf16.msra.mxu0 %v1047_v49 }
 0x4dc   :  { %388 = vadd.xlane.f32.xlu0 %v387_v51  ;;  %v1049_v51 = vld [vmem:[%s1369_s4 + $0x48] sm:$0xff]  }
 0x4e8   :  { %406 = vrot.lane.b32.xlu1 %v1196_v22, %s1117_s18 }
 0x4f2   :  { %404 = vrot.lane.b32.xlu0 %v1199_v27, %s1117_s18 }
 0x560   :  { %v392_v52 = vpop.xlane.xlu1 %391 }
 0x561   :  { %v395_v53 = vpop.xlane.xlu0 %394 }
 0x562   :  { %1075 = vrcp.f32 %v395_v53  ;;  %v1051_v53 = vld [vmem:[%s1369_s4 + $0x38] sm:$0xff]  }
 0x563   :  { %1077 = vrcp.f32 %v392_v52  ;;  %v1050_v52 = vld [vmem:[%s1369_s4 + $0x40] sm:$0xff]  }
 0x564   :  { %v407_v54 = vpop.permute.xlu1 %406 }
 0x565   :  { %v389_v55 = vpop.xlane.xlu0 %388  ;;  %1030 = vmatprep.subr.msk.bf16.mxu1 %vm249_vm5, %v407_v54  ;;  %v416_v56 = vsel %vm249_vm5, %v407_v54, 0  ;;  %v1052_v54 = vld [vmem:[%s1369_s4 + $0x30] sm:$0xff]  }
 0x566   :  { %1079 = vrcp.f32 %v389_v55  ;;  %982 = vmatpush3.bf16.msra.mxu1 %v416_v56  ;;  %v1053_v55 = vld [vmem:[%s1369_s4 + $0x28] sm:$0xff]  }
 0x569   :  { %v405_v57 = vpop.permute.xlu0 %404 }
 0x56a   :  { %983 = vmatprep.subr.bf16.mxu1 %v405_v57 }
 0x56b   :  { %984 = vmatpush3.bf16.msra.mxu1 %v405_v57 }
 0x56c   :  { %989 = vmatprep.subr.bf16.mxu1 %v1045_v0 }
 0x56f   :  { %v1076_v58 = vpop.eup %1075 }
 0x570   :  { %v1078_v59 = vpop.eup %1077  ;;  %v401_v60 = vmul.f32 %v1076_v58, %v1072_v40 }
 0x571   :  { %v400_v61 = vmul.f32 %v1078_v59, %v1070_v47 }
 0x572   :  { %v403_v63 = vpack.c.bf16 %v401_v60, %v401_v60 }
 0x573   :  { %v1080_v22 = vpop.eup %1079 }
 0x574   :  { %v399_v27 = vmul.f32 %v1080_v22, %v1074_v50  ;;  %v1048_v50 = vld [vmem:[%s1368_s3] sm:$0xff]  }
 0x575   :  { %999 = vmatprep.subr.bf16.mxu0 %v1048_v50 }
 0x576   :  { %v402_v62 = vpack.c.bf16 %v400_v61, %v399_v27  ;;  %1000 = vmatpush3.bf16.msra.mxu0 %v1048_v50 }
 0x578   :  { %985 = vmatprep.mubr.msk.bf16.mxu1 %vm201_vm4, %v402_v62 }
 0x579   :  { %986 = vmatmul.mubr.msk.bf16.vlgmr.msra.gmra.mxu1 %vm201_vm4, %v403_v63 }
 0x57a   :  { %990 = vmatpush3.bf16.msra.mxu1 %v1045_v0 }
 0x57b   :  { %991 = vmatprep.subr.bf16.mxu1 %v1046_v1 }
 0x57e   :  { %992 = vmatpush3.bf16.msra.mxu1 %v1046_v1  ;;  %v892_v1 = vld [vmem:[%s1370_s5 + $0x2] ss:$0 sm:$0xff] }
 0x57f   :  { %1005 = vmatprep.subr.bf16.mxu1 %v1049_v51 }
 0x639   :  { %v987_v2 = vpop.f32.mrf.mxu1 }
 0x63b   :  { %v452_v3 = vpop.f32.mrf.mxu1 }
 0x63d   :  { %v988_v4 = vpop.f32.mrf.mxu1 }
 0x63f   :  { %v455_v5 = vpop.f32.mrf.mxu1 }
 0x640   :  { %v1038_v6 = vpack.i.bf16 %v455_v5, %v452_v3 }
 0x642   :  { %1039 = vrot.lane.b32.xlu1 %v1038_v6, %s1118_s23 }
 0x646   :  { %473 = vrot.lane.b32.xlu1 %v987_v2, %s1118_s23 }
 0x6b4   :  { %v1040_v7 = vpop.permute.xlu1 %1039 }
 0x6b5   :  { %v1042_v11 = vunpack.i.h.bf16 %v1040_v7  ;;  %v1041_v12 = vunpack.i.l.bf16 %v1040_v7  ;;  %v893_v7 = vld [vmem:[%s1370_s5 + $0x3] ss:$0 sm:$0xff] }
 0x6b7   :  { %v479_v13 = vsel %vm140_vm2, %v1256_v25, %v1042_v11  ;;  %v478_v15 = vsel %vm140_vm2, %v1254_v23, %v1041_v12 }
 0x6b8   :  { %v481_v16 = vpack.c.bf16 %v479_v13, %v478_v15  ;;  %v474_v18 = vpop.permute.xlu1 %473 }
 0x6b9   :  { %v480_v19 = vsel %vm140_vm2, %v1252_v21, %v474_v18 }
 0x6ba   :  { %v482_v20 = vpack.c.bf16 %v480_v19, %v480_v19  ;;  %993 = vmatprep.mubr.msk.bf16.mxu1 %vm45_vm1, %v481_v16 }
 0x6bc   :  { %994 = vmatmul.mubr.msk.bf16.vlgmr.msra.gmra.mxu1 %vm45_vm1, %v482_v20  ;;  %v1054_v20 = vld [vmem:[%s1369_s4 + $0x20] sm:$0xff]  }
 0x6bd   :  { %1006 = vmatpush3.bf16.msra.mxu1 %v1049_v51 }
 0x6be   :  { %1007 = vmatprep.subr.bf16.mxu1 %v1050_v52 }
 0x6c1   :  { %1008 = vmatpush3.bf16.msra.mxu1 %v1050_v52  ;;  %v907_v52 = vld [vmem:[%s1370_s5 + $0x5] ss:$0 sm:$0xff] }
 0x6c2   :  { %1009 = vmatprep.subr.bf16.mxu1 %v1051_v53 }
 0x6c5   :  { %1010 = vmatpush3.bf16.msra.mxu1 %v1051_v53 }
 0x6c6   :  { %1011 = vmatprep.subr.bf16.mxu1 %v1052_v54 }
 0x6c9   :  { %1012 = vmatpush3.bf16.msra.mxu1 %v1052_v54  ;;  %v908_v54 = vld [vmem:[%s1370_s5 + $0x6] ss:$0 sm:$0xff] }
 0x6ca   :  { %1013 = vmatprep.subr.bf16.mxu1 %v1053_v55 }
 0x6cd   :  { %1014 = vmatpush3.bf16.msra.mxu1 %v1053_v55 }
 0x6ce   :  { %1015 = vmatprep.subr.bf16.mxu1 %v1054_v20 }
 0x6d1   :  { %1016 = vmatpush3.bf16.msra.mxu1 %v1054_v20 }
 0x77c   :  { %v995_v24 = vpop.f32.mrf.mxu1 }
 0x77d   :  { %v552_v25 = vadd.f32 %v995_v24, %v887_v26  ;;  %v1055_v24 = vld [vmem:[%s1369_s4 + $0x18] sm:$0xff]  }
 0x77e   :  { %v543_v28 = vpop.f32.mrf.mxu1  ;;  %1017 = vmatprep.subr.bf16.mxu1 %v1055_v24 }
 0x77f   :  { %v544_v29 = vadd.f32 %v887_v26, %v543_v28  ;;  %v559_v35 = vadd.f32 %v552_v25, %v1180_v10  ;;  %1018 = vmatpush3.bf16.msra.mxu1 %v1055_v24  ;;  %v620_v28 = vld [vmem:[%s1368_s3 + $0x10] sm:$0x1] }
 0x780   :  { %v996_v30 = vpop.f32.mrf.mxu1  ;;  %v621_v25 = vunpack.c.l.bf16 %v620_v28 }
 0x781   :  { %v557_v23 = vadd.f32 %v544_v29, %v1176_v8  ;;  %v566_v38 = vsel %vm39_vm0, %v559_v35, 0.0 }
 0x782   :  { %v546_v31 = vpop.f32.mrf.mxu1  ;;  %v625_v29 = vrot.slane %v621_v25, %v64_v17 }
 0x783   :  { %v547_v33 = vadd.f32 %v887_v26, %v546_v31  ;;  %v560_v21 = vsel %vm45_vm1, %v557_v23, 0.0  ;;  %v1056_v26 = vld [vmem:[%s1369_s4 + $0x10] sm:$0xff]  }
 0x784   :  { %561 = vadd.xlane.f32.xlu0 %v560_v21  ;;  %1019 = vmatprep.subr.bf16.mxu1 %v1056_v26 }
 0x785   :  { %v558_v36 = vadd.f32 %v547_v33, %v1178_v9  ;;  %1020 = vmatpush3.bf16.msra.mxu1 %v1056_v26 }
 0x787   :  { %v563_v37 = vsel %vm45_vm1, %v558_v36, 0.0 }
 0x788   :  { %564 = vadd.xlane.f32.xlu1 %v563_v37  ;;  %567 = vadd.xlane.f32.xlu0 %v566_v38 }
 0x80d   :  { %v562_v39 = vpop.xlane.xlu0 %561 }
 0x80e   :  { %v570_v41 = vmul.f32 0.03125, %v562_v39 }
 0x810   :  { %v573_v42 = vsub.f32 %v557_v23, %v570_v41 }
 0x811   :  { %v565_v43 = vpop.xlane.xlu1 %564  ;;  %v568_v8 = vpop.xlane.xlu0 %567 }
 0x812   :  { %v571_v34 = vmul.f32 0.03125, %v565_v43  ;;  %v572_v44 = vmul.f32 0.03125, %v568_v8  ;;  %v576_v45 = vmul.f32 %v573_v42, %v573_v42 }
 0x814   :  { %v574_v32 = vsub.f32 %v558_v36, %v571_v34  ;;  %v575_v46 = vsub.f32 %v559_v35, %v572_v44  ;;  %v579_v10 = vsel %vm45_vm1, %v576_v45, 0.0 }
 0x815   :  { %580 = vadd.xlane.f32.xlu0 %v579_v10 }
 0x816   :  { %v577_v9 = vmul.f32 %v574_v32, %v574_v32  ;;  %v578_v47 = vmul.f32 %v575_v46, %v575_v46 }
 0x818   :  { %v582_v40 = vsel %vm45_vm1, %v577_v9, 0.0  ;;  %v585_v48 = vsel %vm39_vm0, %v578_v47, 0.0 }
 0x819   :  { %583 = vadd.xlane.f32.xlu1 %v582_v40  ;;  %586 = vadd.xlane.f32.xlu0 %v585_v48 }
 0x89e   :  { %v581_v56 = vpop.xlane.xlu0 %580 }
 0x89f   :  { %v588_v57 = vmul.f32 0.03125, %v581_v56 }
 0x8a1   :  { %v591_v58 = vadd.f32 1e-05, %v588_v57 }
 0x8a2   :  { %v584_v59 = vpop.xlane.xlu1 %583  ;;  %v587_v22 = vpop.xlane.xlu0 %586 }
 0x8a3   :  { %1081 = vrsqrt.f32 %v591_v58  ;;  %v589_v60 = vmul.f32 0.03125, %v584_v59  ;;  %v590_v27 = vmul.f32 0.03125, %v587_v22 }
 0x8a5   :  { %v592_v61 = vadd.f32 1e-05, %v589_v60  ;;  %v593_v62 = vadd.f32 1e-05, %v590_v27 }
 0x8a7   :  { %1083 = vrsqrt.f32 %v592_v61 }
 0x8a8   :  { %1085 = vrsqrt.f32 %v593_v62 }
 0x8b0   :  { %v1082_v63 = vpop.eup %1081 }
 0x8b1   :  { %v597_v0 = vmul.f32 %v1082_v63, %v573_v42 }
 0x8b3   :  { %v604_v5 = vmul.f32 %v892_v1, %v597_v0 }
 0x8b4   :  { %v1084_v2 = vpop.eup %1083 }
 0x8b5   :  { %v1086_v3 = vpop.eup %1085  ;;  %v598_v4 = vmul.f32 %v1084_v2, %v574_v32  ;;  %v611_v13 = vadd.f32 %v893_v7, %v604_v5 }
 0x8b6   :  { %v599_v6 = vmul.f32 %v1086_v3, %v575_v46  ;;  %v910_v3 = vld [vmem:[%s1370_s5 + $0x8] ss:$0 sm:$0xff] }
 0x8b7   :  { %v605_v11 = vmul.f32 %v892_v1, %v598_v4 }
 0x8b8   :  { %v606_v12 = vmul.f32 %v892_v1, %v599_v6  ;;  %v909_v1 = vld [vmem:[%s1370_s5 + $0x7] ss:$0 sm:$0xff] }
 0x8b9   :  { %v612_v15 = vadd.f32 %v893_v7, %v605_v11 }
 0x8ba   :  { %v613_v16 = vadd.f32 %v893_v7, %v606_v12 }
 0x8bb   :  { %v614_v18 = vpack.c.bf16 %v612_v15, %v611_v13 }
 0x8bc   :  { %v615_v19 = vpack.c.bf16 %v613_v16, %v613_v16 }
 0x8bd   :  { %1001 = vmatprep.mubr.msk.bf16.mxu0 %vm45_vm1, %v614_v18 }
 0x8be   :  { %1002 = vmatmul.mubr.msk.bf16.vlgmr.msra.gmra.mxu0 %vm45_vm1, %v615_v19 }
 0x97e   :  { %v1003_v30 = vpop.f32.mrf.mxu0 }
 0x97f   :  { %v687_v31 = vadd.f32 %v1003_v30, %v625_v29 }
 0x980   :  { %v678_v23 = vpop.f32.mrf.mxu0 }
 0x981   :  { %v679_v21 = vadd.f32 %v678_v23, %v625_v29  ;;  %v694_v37 = vmax.f32 %v687_v31, 0.0 }
 0x982   :  { %v1004_v33 = vpop.f32.mrf.mxu0 }
 0x983   :  { %v692_v38 = vmax.f32 %v679_v21, 0.0  ;;  %v696_v42 = vpack.c.bf16 %v694_v37, %v694_v37 }
 0x984   :  { %v681_v35 = vpop.f32.mrf.mxu0 }
 0x985   :  { %v682_v36 = vadd.f32 %v681_v35, %v625_v29 }
 0x987   :  { %v693_v39 = vmax.f32 %v682_v36, 0.0 }
 0x989   :  { %v695_v41 = vpack.c.bf16 %v693_v39, %v692_v38 }
 0x98b   :  { %1021 = vmatprep.mubr.bf16.mxu1 %v695_v41 }
 0x98c   :  { %1022 = vmatmul.mubr.bf16.vlgmr.msra.gmra.mxu1 %v696_v42 }
 0xa4c   :  { %v1023_v43 = vpop.f32.mrf.mxu1 }
 0xa4e   :  { %v795_v8 = vpop.f32.mrf.mxu1 }
 0xa4f   :  { %v807_v17 = vadd.f32 %v795_v8, %v611_v13 }
 0xa50   :  { %v1024_v34 = vpop.f32.mrf.mxu1 }
 0xa51   :  { %v812_v44 = vadd.f32 %v906_v14, %v807_v17 }
 0xa52   :  { %v798_v45 = vpop.f32.mrf.mxu1 }
 0xa53   :  { %v813_v32 = vsel %vm45_vm1, %v812_v44, 0.0 }
 0xa54   :  { %814 = vadd.xlane.f32.xlu1 %v813_v32 }
 0xadd   :  { %v815_v46 = vpop.xlane.xlu1 %814 }
 0xade   :  { %v816_v10 = vmul.f32 0.03125, %v815_v46 }
 0xae0   :  { %v817_v9 = vsub.f32 %v812_v44, %v816_v10 }
 0xae2   :  { %v818_v47 = vmul.f32 %v817_v9, %v817_v9 }
 0xae4   :  { %v819_v40 = vsel %vm45_vm1, %v818_v47, 0.0 }
 0xae5   :  { %820 = vadd.xlane.f32.xlu0 %v819_v40 }
 0xb6e   :  { %v821_v48 = vpop.xlane.xlu0 %820 }
 0xb6f   :  { %v822_v49 = vmul.f32 0.03125, %v821_v48 }
 0xb71   :  { %v823_v50 = vadd.f32 1e-05, %v822_v49 }
 0xb73   :  { %1087 = vrsqrt.f32 %v823_v50 }
 0xb80   :  { %v1088_v51 = vpop.eup %1087 }
 0xb81   :  { %v825_v53 = vmul.f32 %v1088_v51, %v817_v9 }
 0xb83   :  { %v830_v55 = vmul.f32 %v907_v52, %v825_v53 }
 0xb85   :  { %v835_v56 = vadd.f32 %v908_v54, %v830_v55 }
 0xb87   :  { %v836_v57 = vsel %vm39_vm0, %v835_v56, 0.0 }
 0xb88   :  { %837 = vadd.xlane.f32.xlu1 %v836_v57 }
 0xc11   :  { %v838_v58 = vpop.xlane.xlu1 %837 }
 0xc12   :  { %v839_v59 = vmul.f32 0.03125, %v838_v58 }
 0xc14   :  { %v840_v22 = vsub.f32 %v835_v56, %v839_v59 }
 0xc16   :  { %v841_v60 = vmul.f32 %v840_v22, %v840_v22 }
 0xc18   :  { %v842_v27 = vsel %vm39_vm0, %v841_v60, 0.0 }
 0xc19   :  { %843 = vadd.xlane.f32.xlu0 %v842_v27 }
 0xca2   :  { %v844_v61 = vpop.xlane.xlu0 %843 }
 0xca3   :  { %v845_v62 = vmul.f32 0.03125, %v844_v61 }
 0xca5   :  { %v846_v63 = vadd.f32 1e-05, %v845_v62 }
 0xca7   :  { %1089 = vrsqrt.f32 %v846_v63 }
 0xcb4   :  { %v1090_v0 = vpop.eup %1089 }
 0xcb5   :  { %v848_v2 = vmul.f32 %v1090_v0, %v840_v22 }
 0xcb7   :  { %v853_v4 = vmul.f32 %v909_v1, %v848_v2 }
 0xcb9   :  { %v858_v5 = vadd.f32 %v910_v3, %v853_v4 }
 0xcbb   :  { %859 = vst.msk [vmem:[#allocation3] sm:$0x3] %vm39_vm0, %v858_v5 }
 0xcbc   :  { %1102 = shalt.err (!%p1099_p4)
}
 0xcbd   :  { %869 = dma.vmem_to_hbm [thread:$0]  %s867_s9, 32, %s1371_s6, [#allocation4]  }
 0xcbe   :  { %1111 = dma.done.wait [#allocation4], 32  }
 0xcbf   :  { %1112 = vsyncadd [#allocation4], 4294967264 }
 0xcc0   :  { %873 = vsyncpa [#allocation4], 1 }

</bundles_post_ra>
